<compile_context>
chip_gen: v5e
topology: v5e:2x2
jax: 0.10.0
libtpu: 0.0.40
codegen_flags: <defaults>
</compile_context>

<pallas_src>
import functools

import jax
import jax.numpy as jnp
from jax.experimental import pallas as pl
from jax.experimental.pallas import tpu as pltpu

LANE = 128
SUBLANE = 8


def _round_up(n, m):
    return ((n + m - 1) // m) * m


def _cdiv(a, b):
    return (a + b - 1) // b


def bc_mlp_kernel(obs_ref, w1_ref, b1_ref, w2_ref, b2_ref, wm_ref, bm_ref, out_ref):
    """Fused forward for one batch tile.  Matmuls accumulate in f32 on the MXU; bias add,
    relu and tanh stay f32.  Activations are cast to the weight dtype only for the MXU."""
    x = obs_ref[...].astype(w1_ref.dtype)
    h1 = jnp.dot(x, w1_ref[...], preferred_element_type=jnp.float32) + b1_ref[...]
    h1 = jnp.maximum(h1, 0.0)
    h2 = jnp.dot(h1.astype(w2_ref.dtype), w2_ref[...],
                 preferred_element_type=jnp.float32) + b2_ref[...]
    h2 = jnp.maximum(h2, 0.0)
    m = jnp.dot(h2.astype(wm_ref.dtype), wm_ref[...],
                preferred_element_type=jnp.float32) + bm_ref[...]
    out_ref[...] = jnp.tanh(m)


def init_params(key, obs_dim, action_dim, hidden_dim):
    """Deterministic init mimicking nn.Linear default (uniform +-1/sqrt(fan_in)).
    Weights stored pre-transposed as (in_features, out_features)."""
    def linear(k, fan_in, fan_out):
        kw, kb = jax.random.split(k)
        bound = 1.0 / jnp.sqrt(fan_in)
        w = jax.random.uniform(kw, (fan_in, fan_out), jnp.float32, -bound, bound)
        b = jax.random.uniform(kb, (1, fan_out), jnp.float32, -bound, bound)
        return w, b

    k1, k2, k3, k4 = jax.random.split(key, 4)
    w1, b1 = linear(k1, obs_dim, hidden_dim)
    w2, b2 = linear(k2, hidden_dim, hidden_dim)
    wm, bm = linear(k3, hidden_dim, action_dim)
    # log_std_linear is initialized for parity with __init__ but unused in forward.
    wl, bl = linear(k4, hidden_dim, action_dim)
    return {"w1": w1, "b1": b1, "w2": w2, "b2": b2,
            "wm": wm, "bm": bm, "wl": wl, "bl": bl}


def prepare_params(params, mxu_dtype=jnp.bfloat16):
    """One-time: pad only the hidden dim to the 128-lane width (obs_dim / action_dim stay
    narrow) and cast the MXU weight operands (default bf16 on every TPU generation).
    Biases stay f32 (added post-accumulation)."""
    obs_dim = params["w1"].shape[0]
    hidden_dim = params["w1"].shape[1]
    action_dim = params["wm"].shape[1]
    hid_p = _round_up(hidden_dim, LANE)

    def pad2(a, rows, cols, dtype):
        out = jnp.zeros((rows, cols), dtype)
        return out.at[: a.shape[0], : a.shape[1]].set(a.astype(dtype))

    return {
        "w1": pad2(params["w1"], obs_dim, hid_p, mxu_dtype),   # (obs_dim, hid_p)
        "b1": pad2(params["b1"], 1, hid_p, jnp.float32),
        "w2": pad2(params["w2"], hid_p, hid_p, mxu_dtype),
        "b2": pad2(params["b2"], 1, hid_p, jnp.float32),
        "wm": pad2(params["wm"], hid_p, action_dim, mxu_dtype),  # (hid_p, action_dim)
        "bm": params["bm"].astype(jnp.float32),                  # (1, action_dim)
    }


@functools.partial(jax.jit, static_argnames=("tile_b",))
def bc_network_forward(obs, prep, *, tile_b=1024):
    """obs: (B, obs_dim) float32.  prep: output of prepare_params.
    Returns (B, action_dim) float32."""
    B, obs_dim = obs.shape
    w1, b1 = prep["w1"], prep["b1"]
    w2, b2 = prep["w2"], prep["b2"]
    wm, bm = prep["wm"], prep["bm"]
    action_dim = wm.shape[1]

    # Batch tile: multiple of 8 sublanes, at most tile_b, capped at ~B/2 so the "parallel"
    # batch grid keeps >= 2 steps when B allows it (v7x megacore; harmless on v5e/v6e).
    tb = max(SUBLANE, min(tile_b, _round_up(_cdiv(B, 2), SUBLANE)))
    B_p = _round_up(B, tb)

    # Pad rows only (no lane padding of obs), and only when needed; jit fuses this.
    if B_p != B:
        x = jnp.zeros((B_p, obs_dim), obs.dtype).at[:B, :].set(obs)
    else:
        x = obs

    grid = (B_p // tb,)

    out = pl.pallas_call(
        bc_mlp_kernel,
        out_shape=jax.ShapeDtypeStruct((B_p, action_dim), jnp.float32),
        grid=grid,
        in_specs=[
            pl.BlockSpec((tb, obs_dim), lambda i: (i, 0)),   # obs: narrow, tiled along batch
            pl.BlockSpec(w1.shape, lambda i: (0, 0)),        # weights/biases: VMEM-resident
            pl.BlockSpec(b1.shape, lambda i: (0, 0)),
            pl.BlockSpec(w2.shape, lambda i: (0, 0)),
            pl.BlockSpec(b2.shape, lambda i: (0, 0)),
            pl.BlockSpec(wm.shape, lambda i: (0, 0)),
            pl.BlockSpec(bm.shape, lambda i: (0, 0)),
        ],
        out_specs=pl.BlockSpec((tb, action_dim), lambda i: (i, 0)),  # narrow output stream
        compiler_params=pltpu.CompilerParams(
            dimension_semantics=("parallel",)),
    )(x, w1, b1, w2, b2, wm, bm)

    return out if B_p == B else out[:B]


def reference_forward(obs, p):
    x = jnp.maximum(obs @ p["w1"] + p["b1"], 0.0)
    x = jnp.maximum(x @ p["w2"] + p["b2"], 0.0)
    return jnp.tanh(x @ p["wm"] + p["bm"])


if __name__ == "__main__":
    obs_dim, action_dim, hidden_dim = 16, 4, 32
    batch = 2

    key = jax.random.PRNGKey(0)
    kp, kx, kx2 = jax.random.split(key, 3)
    params = init_params(kp, obs_dim, action_dim, hidden_dim)
    obs = jax.random.normal(kx, (batch, obs_dim), dtype=jnp.float32)

    ref = reference_forward(obs, params)

    # f32 MXU path (exact parity with the f32 reference).
    prep_f32 = prepare_params(params, mxu_dtype=jnp.float32)
    out_f32 = jax.block_until_ready(bc_network_forward(obs, prep_f32))
    assert out_f32.shape == (batch, action_dim)
    assert jnp.allclose(out_f32, ref, atol=1e-5, rtol=1e-5)

    # bf16 MXU weights (default; bf16-native MXU on v5e/v6e/v7x, halves resident-weight traffic).
    prep_bf16 = prepare_params(params, mxu_dtype=jnp.bfloat16)
    out_bf16 = jax.block_until_ready(bc_network_forward(obs, prep_bf16))
    assert out_bf16.shape == (batch, action_dim)
    assert jnp.allclose(out_bf16, ref, atol=3e-2, rtol=3e-2)

    # Larger, non-tile-divisible batch: exercises row padding + multi-step parallel grid.
    big_b = 300
    obs_big = jax.random.normal(kx2, (big_b, obs_dim), dtype=jnp.float32)
    ref_big = reference_forward(obs_big, params)
    out_big = jax.block_until_ready(bc_network_forward(obs_big, prep_f32))
    assert out_big.shape == (big_b, action_dim)
    assert jnp.allclose(out_big, ref_big, atol=1e-5, rtol=1e-5)

    print("KERNEL_OK")
</pallas_src>

<mosaic_0001>
module attributes {stable_mosaic.version = 11 : i64} {
  func.func @bc_mlp_kernel(%arg0: i32, %arg1: memref<8x16xf32, #tpu.memory_space<vmem>>, %arg2: memref<16x128xf32, #tpu.memory_space<vmem>>, %arg3: memref<1x128xf32, #tpu.memory_space<vmem>>, %arg4: memref<128x128xf32, #tpu.memory_space<vmem>>, %arg5: memref<1x128xf32, #tpu.memory_space<vmem>>, %arg6: memref<128x4xf32, #tpu.memory_space<vmem>>, %arg7: memref<1x4xf32, #tpu.memory_space<vmem>>, %arg8: memref<8x4xf32, #tpu.memory_space<vmem>>) attributes {dimension_semantics = [#tpu.dimension_semantics<parallel>], iteration_bounds = array<i64: 1>, scalar_prefetch = 0 : i64, scratch_operands = 0 : i64, tpu.core_type = #tpu.core_type<tc>, window_params = [{transform_indices = @transform_0, window_bounds = array<i64: 8, 16>}, {pipeline_mode = #tpu.pipeline_mode<synchronous>, transform_indices = @transform_1, window_bounds = array<i64: 16, 128>}, {pipeline_mode = #tpu.pipeline_mode<synchronous>, transform_indices = @transform_2, window_bounds = array<i64: 1, 128>}, {pipeline_mode = #tpu.pipeline_mode<synchronous>, transform_indices = @transform_3, window_bounds = array<i64: 128, 128>}, {pipeline_mode = #tpu.pipeline_mode<synchronous>, transform_indices = @transform_4, window_bounds = array<i64: 1, 128>}, {pipeline_mode = #tpu.pipeline_mode<synchronous>, transform_indices = @transform_5, window_bounds = array<i64: 128, 4>}, {pipeline_mode = #tpu.pipeline_mode<synchronous>, transform_indices = @transform_6, window_bounds = array<i64: 1, 4>}, {transform_indices = @transform_7, window_bounds = array<i64: 8, 4>}]} {
    %c0 = arith.constant 0 : index
    %c0_0 = arith.constant 0 : index
    %0 = vector.load %arg1[%c0, %c0_0] : memref<8x16xf32, #tpu.memory_space<vmem>>, vector<8x16xf32>
    %c0_1 = arith.constant 0 : index
    %c0_2 = arith.constant 0 : index
    %1 = vector.load %arg2[%c0_1, %c0_2] : memref<16x128xf32, #tpu.memory_space<vmem>>, vector<16x128xf32>
    %cst = arith.constant dense<0.000000e+00> : vector<8x128xf32>
    %2 = tpu.matmul %0, %1, %cst {dimension_numbers = #tpu.dot_dimension_numbers<[1], [0], [0], [1], [0, 0, 1, 1], [], []>} : vector<8x16xf32>, vector<16x128xf32>, vector<8x128xf32> -> vector<8x128xf32>
    %c0_3 = arith.constant 0 : index
    %c0_4 = arith.constant 0 : index
    %3 = vector.load %arg3[%c0_3, %c0_4] : memref<1x128xf32, #tpu.memory_space<vmem>>, vector<1x128xf32>
    %4 = vector.broadcast %3 : vector<1x128xf32> to vector<8x128xf32>
    %5 = arith.addf %2, %4 : vector<8x128xf32>
    %cst_5 = arith.constant 0.000000e+00 : f32
    %6 = vector.broadcast %cst_5 : f32 to vector<8x128xf32>
    %7 = arith.maximumf %5, %6 : vector<8x128xf32>
    %c0_6 = arith.constant 0 : index
    %c0_7 = arith.constant 0 : index
    %8 = vector.load %arg4[%c0_6, %c0_7] : memref<128x128xf32, #tpu.memory_space<vmem>>, vector<128x128xf32>
    %cst_8 = arith.constant dense<0.000000e+00> : vector<8x128xf32>
    %9 = tpu.matmul %7, %8, %cst_8 {dimension_numbers = #tpu.dot_dimension_numbers<[1], [0], [0], [1], [0, 0, 1, 1], [], []>} : vector<8x128xf32>, vector<128x128xf32>, vector<8x128xf32> -> vector<8x128xf32>
    %c0_9 = arith.constant 0 : index
    %c0_10 = arith.constant 0 : index
    %10 = vector.load %arg5[%c0_9, %c0_10] : memref<1x128xf32, #tpu.memory_space<vmem>>, vector<1x128xf32>
    %11 = vector.broadcast %10 : vector<1x128xf32> to vector<8x128xf32>
    %12 = arith.addf %9, %11 : vector<8x128xf32>
    %cst_11 = arith.constant 0.000000e+00 : f32
    %13 = vector.broadcast %cst_11 : f32 to vector<8x128xf32>
    %14 = arith.maximumf %12, %13 : vector<8x128xf32>
    %c0_12 = arith.constant 0 : index
    %c0_13 = arith.constant 0 : index
    %15 = vector.load %arg6[%c0_12, %c0_13] : memref<128x4xf32, #tpu.memory_space<vmem>>, vector<128x4xf32>
    %cst_14 = arith.constant dense<0.000000e+00> : vector<8x4xf32>
    %16 = tpu.matmul %14, %15, %cst_14 {dimension_numbers = #tpu.dot_dimension_numbers<[1], [0], [0], [1], [0, 0, 1, 1], [], []>} : vector<8x128xf32>, vector<128x4xf32>, vector<8x4xf32> -> vector<8x4xf32>
    %c0_15 = arith.constant 0 : index
    %c0_16 = arith.constant 0 : index
    %17 = vector.load %arg7[%c0_15, %c0_16] : memref<1x4xf32, #tpu.memory_space<vmem>>, vector<1x4xf32>
    %18 = vector.broadcast %17 : vector<1x4xf32> to vector<8x4xf32>
    %19 = arith.addf %16, %18 : vector<8x4xf32>
    %20 = math.tanh %19 : vector<8x4xf32>
    %c0_17 = arith.constant 0 : index
    %c0_18 = arith.constant 0 : index
    %21 = vector.load %arg8[%c0_17, %c0_18] : memref<8x4xf32, #tpu.memory_space<vmem>>, vector<8x4xf32>
    tpu.vector_store %arg8[%c0_17, %c0_18], %20 {strides = array<i32>} : memref<8x4xf32, #tpu.memory_space<vmem>>, vector<8x4xf32>,
    return
  }
  func.func @transform_0(%arg0: i32) -> (i32, i32) {
    %c0_i32 = arith.constant 0 : i32
    %c0_i32_0 = arith.constant 0 : i32
    return %arg0, %c0_i32 : i32, i32
  }
  func.func @transform_1(%arg0: i32) -> (i32, i32) {
    %c0_i32 = arith.constant 0 : i32
    %c0_i32_0 = arith.constant 0 : i32
    %c0_i32_1 = arith.constant 0 : i32
    return %c0_i32, %c0_i32_0 : i32, i32
  }
  func.func @transform_2(%arg0: i32) -> (i32, i32) {
    %c0_i32 = arith.constant 0 : i32
    %c0_i32_0 = arith.constant 0 : i32
    %c0_i32_1 = arith.constant 0 : i32
    return %c0_i32, %c0_i32_0 : i32, i32
  }
  func.func @transform_3(%arg0: i32) -> (i32, i32) {
    %c0_i32 = arith.constant 0 : i32
    %c0_i32_0 = arith.constant 0 : i32
    %c0_i32_1 = arith.constant 0 : i32
    return %c0_i32, %c0_i32_0 : i32, i32
  }
  func.func @transform_4(%arg0: i32) -> (i32, i32) {
    %c0_i32 = arith.constant 0 : i32
    %c0_i32_0 = arith.constant 0 : i32
    %c0_i32_1 = arith.constant 0 : i32
    return %c0_i32, %c0_i32_0 : i32, i32
  }
  func.func @transform_5(%arg0: i32) -> (i32, i32) {
    %c0_i32 = arith.constant 0 : i32
    %c0_i32_0 = arith.constant 0 : i32
    %c0_i32_1 = arith.constant 0 : i32
    return %c0_i32, %c0_i32_0 : i32, i32
  }
  func.func @transform_6(%arg0: i32) -> (i32, i32) {
    %c0_i32 = arith.constant 0 : i32
    %c0_i32_0 = arith.constant 0 : i32
    %c0_i32_1 = arith.constant 0 : i32
    return %c0_i32, %c0_i32_0 : i32, i32
  }
  func.func @transform_7(%arg0: i32) -> (i32, i32) {
    %c0_i32 = arith.constant 0 : i32
    %c0_i32_0 = arith.constant 0 : i32
    return %arg0, %c0_i32 : i32, i32
  }
}

</mosaic_0001>

<bundles_post_ra>
// kernel: bc_network_forward.1
= control target key start
LH: loop header
LB: loop body
LE: loop exit
PB: predicated region body
PF: predicated region fallthrough
CT: control target
= control target key end

     0   :  { %12 = vsyncpa [#allocation3], 0  ;;  %s198_s27 = smov [#allocation2]   ;;  %s199_s29 = smov 128   ;;  %s355_s0 = inlined_call_operand.vmem [shape: f32[8,16], index: 0, kind: input, shape index: {}]   ;;  %s356_s1 = inlined_call_operand.hbm [shape: f32[16,128], index: 1, kind: input, shape index: {}]   ;;  %s357_s2 = inlined_call_operand.vmem [shape: f32[1,128], index: 2, kind: input, shape index: {}]   ;;  %s358_s3 = inlined_call_operand.vmem [shape: f32[128,128], index: 3, kind: input, shape index: {}]   ;;  %s359_s4 = inlined_call_operand.vmem [shape: f32[1,128], index: 4, kind: input, shape index: {}]   ;;  %s360_s5 = inlined_call_operand.vmem [shape: f32[128,4], index: 5, kind: input, shape index: {}]   ;;  %s361_s6 = inlined_call_operand.vmem [shape: f32[1,4], index: 6, kind: input, shape index: {}]   ;;  %s362_s7 = inlined_call_operand.vmem [shape: f32[8,4], index: 7, kind: output, shape index: {}]  }
   0x1   :  { %s19_s26 = sshll.u32 %s356_s1, 4  ;;  %s21_s28 = sshll.u32 %s198_s27, 4  ;;  %s20_s26 = int_to_ptr.hbm [resolvable:$true] %s19_s26  ;;  %s22_s28 = int_to_ptr.vmem [resolvable:$true] %s21_s28 }
   0x2   :  { %s200_s30 = smov 8  }
   0x3   :  { %27 = dma.hbm_to_vmem [thread:$0]  %s20_s26, 256, %s22_s28, [#allocation3], %s199_s29, %s199_s29, %s200_s30  }
   0x4   :  { %196 = dma.done.wait [#allocation3], 256  }
   0x5   :  { %197 = vsyncadd [#allocation3], 4294967040  ;;  %v44_v0 = vld [vmem:[#allocation2 + $0x8] sm:$0xff]  ;;  %v43_v1 = vld [vmem:[#allocation2] sm:$0xff]  ;;  %vm49_vm0 = vcmask 130048   ;;  %vm156_vm1 = vcmask 31744  }
   0x6   :  { %67 = vmatpush.msra.mxu0 %v44_v0  ;;  %v42_v2 = vld [vmem:[%s355_s0] sm:$0xff]  ;;  %v89_v3 = vld [vmem:[%s358_s3 + $0x78] sm:$0xff]  ;;  %v88_v4 = vld [vmem:[%s358_s3 + $0x70] sm:$0xff] }
   0x7   :  { %94 = vmatpush.msra.mxu1 %v89_v3  ;;  %v87_v5 = vld [vmem:[%s358_s3 + $0x68] sm:$0xff]  ;;  %v86_v6 = vld [vmem:[%s358_s3 + $0x60] sm:$0xff]  ;;  %v85_v7 = vld [vmem:[%s358_s3 + $0x58] sm:$0xff] }
   0x8   :  { %68 = vmatpush.msra.mxu0 %v43_v1  ;;  %v84_v8 = vld [vmem:[%s358_s3 + $0x50] sm:$0xff]  ;;  %v83_v9 = vld [vmem:[%s358_s3 + $0x48] sm:$0xff]  ;;  %v82_v10 = vld [vmem:[%s358_s3 + $0x40] sm:$0xff] }
   0x9   :  { %163 = vmatmul.msk.f32.vlgmr.msra.gmra.mxu0 %vm49_vm0, %v42_v2  ;;  %95 = vmatpush.msra.mxu1 %v88_v4  ;;  %v81_v11 = vld [vmem:[%s358_s3 + $0x38] sm:$0xff]  ;;  %v80_v12 = vld [vmem:[%s358_s3 + $0x30] sm:$0xff]  ;;  %v79_v13 = vld [vmem:[%s358_s3 + $0x28] sm:$0xff] }
   0xa   :  { %v78_v14 = vld [vmem:[%s358_s3 + $0x20] sm:$0xff]  ;;  %v77_v15 = vld [vmem:[%s358_s3 + $0x18] sm:$0xff]  ;;  %v76_v16 = vld [vmem:[%s358_s3 + $0x10] sm:$0xff] }
   0xb   :  { %96 = vmatpush.msra.mxu1 %v87_v5  ;;  %v75_v17 = vld [vmem:[%s358_s3 + $0x8] sm:$0xff]  ;;  %v74_v18 = vld [vmem:[%s358_s3] sm:$0xff]  ;;  %v130_v19 = vld [vmem:[%s360_s5 + $0x78] sm:$0xff] }
   0xc   :  { %v129_v20 = vld [vmem:[%s360_s5 + $0x70] sm:$0xff]  ;;  %135 = vmatpush.msra.mxu2 %v130_v19  ;;  %v128_v21 = vld [vmem:[%s360_s5 + $0x68] sm:$0xff]  ;;  %v127_v22 = vld [vmem:[%s360_s5 + $0x60] sm:$0xff] }
   0xd   :  { %97 = vmatpush.msra.mxu1 %v86_v6  ;;  %v126_v23 = vld [vmem:[%s360_s5 + $0x58] sm:$0xff]  ;;  %v125_v24 = vld [vmem:[%s360_s5 + $0x50] sm:$0xff]  ;;  %v124_v25 = vld [vmem:[%s360_s5 + $0x48] sm:$0xff] }
   0xe   :  { %136 = vmatpush.msra.mxu2 %v129_v20  ;;  %v123_v26 = vld [vmem:[%s360_s5 + $0x40] sm:$0xff]  ;;  %v122_v27 = vld [vmem:[%s360_s5 + $0x38] sm:$0xff]  ;;  %v121_v28 = vld [vmem:[%s360_s5 + $0x30] sm:$0xff] }
   0xf   :  { %98 = vmatpush.msra.mxu1 %v85_v7  ;;  %v120_v29 = vld [vmem:[%s360_s5 + $0x28] sm:$0xff]  ;;  %v119_v30 = vld [vmem:[%s360_s5 + $0x20] sm:$0xff]  ;;  %v118_v31 = vld [vmem:[%s360_s5 + $0x18] sm:$0xff] }
  0x10   :  { %137 = vmatpush.msra.mxu2 %v128_v21  ;;  %v167_v32 = vld [vmem:[%s357_s2] ss:$0 sm:$0xff]  ;;  %v117_v36 = vld [vmem:[%s360_s5 + $0x10] sm:$0xff]  ;;  %v116_v37 = vld [vmem:[%s360_s5 + $0x8] sm:$0xff] }
  0x11   :  { %99 = vmatpush.msra.mxu1 %v84_v8  ;;  %v115_v38 = vld [vmem:[%s360_s5] sm:$0xff] }
  0x12   :  { %138 = vmatpush.msra.mxu2 %v127_v22  ;;  %v168_v39 = vld [vmem:[%s359_s4] ss:$0 sm:$0xff] }
  0x13   :  { %100 = vmatpush.msra.mxu1 %v83_v9  ;;  %v169_v43 = vld [vmem:[%s361_s6] ss:$0 sm:$0xff] }
  0x14   :  { %139 = vmatpush.msra.mxu2 %v126_v23 }
  0x15   :  { %101 = vmatpush.msra.mxu1 %v82_v10 }
  0x16   :  { %140 = vmatpush.msra.mxu2 %v125_v24 }
  0x17   :  { %102 = vmatpush.msra.mxu1 %v81_v11 }
  0x18   :  { %141 = vmatpush.msra.mxu2 %v124_v25 }
  0x19   :  { %103 = vmatpush.msra.mxu1 %v80_v12 }
  0x1a   :  { %142 = vmatpush.msra.mxu2 %v123_v26 }
  0x1b   :  { %104 = vmatpush.msra.mxu1 %v79_v13 }
  0x1c   :  { %143 = vmatpush.msra.mxu2 %v122_v27 }
  0x1d   :  { %105 = vmatpush.msra.mxu1 %v78_v14 }
  0x1e   :  { %144 = vmatpush.msra.mxu2 %v121_v28 }
  0x1f   :  { %106 = vmatpush.msra.mxu1 %v77_v15 }
  0x20   :  { %145 = vmatpush.msra.mxu2 %v120_v29 }
  0x21   :  { %107 = vmatpush.msra.mxu1 %v76_v16 }
  0x22   :  { %146 = vmatpush.msra.mxu2 %v119_v30 }
  0x23   :  { %108 = vmatpush.msra.mxu1 %v75_v17 }
  0x24   :  { %147 = vmatpush.msra.mxu2 %v118_v31 }
  0x25   :  { %109 = vmatpush.msra.mxu1 %v74_v18 }
  0x26   :  { %148 = vmatpush.msra.mxu2 %v117_v36 }
  0x28   :  { %149 = vmatpush.msra.mxu2 %v116_v37 }
  0x2a   :  { %150 = vmatpush.msra.mxu2 %v115_v38 }
  0x86   :  { %v70_v33 = vpop.f32.mrf.mxu0 }
  0x87   :  { %v71_v34 = vadd.f32 %v167_v32, %v70_v33 }
  0x89   :  { %v73_v35 = vmax.f32 %v71_v34, 0.0 }
  0x8b   :  { %110 = vmatmul.f32.vlgmr.msra.gmra.mxu1 %v73_v35 }
 0x108   :  { %v111_v40 = vpop.f32.mrf.mxu1 }
 0x109   :  { %v112_v41 = vadd.f32 %v168_v39, %v111_v40 }
 0x10b   :  { %v114_v42 = vmax.f32 %v112_v41, 0.0 }
 0x10d   :  { %151 = vmatmul.f32.vlgmr.msra.gmra.mxu2 %v114_v42 }
 0x190   :  { %v152_v44 = vpop.f32.mrf.mxu2 }
 0x191   :  { %v153_v45 = vadd.f32 %v169_v43, %v152_v44 }
 0x193   :  { %170 = vtanh.f32 %v153_v45 }
 0x199   :  { %v171_v46 = vpop.eup %170 }
 0x19a   :  { %157 = vst.msk [vmem:[%s362_s7] sm:$0xff] %vm156_vm1, %v171_v46 }
 0x19b   :  { %162 = vsyncpa [#allocation3], 1 }

</bundles_post_ra>
